<compile_context>
chip_gen: v7x
topology: tpu7x:2x2x1
jax: 0.10.0
libtpu: 0.0.40
codegen_flags: <defaults>
</compile_context>

<pallas_src>
import math
import functools

import jax
import jax.numpy as jnp
from jax import lax
from jax.experimental import pallas as pl
from jax.experimental.pallas import tpu as pltpu


# ---------------------------------------------------------------------------
# Parameter setup (mirrors PositionalEncoder.__init__)
# ---------------------------------------------------------------------------
def make_pos_features(max_length: int, embed_dim: int) -> jnp.ndarray:
    """Replicates the sin/cos positional table built in __init__ (float32)."""
    positions = jnp.arange(0, max_length, dtype=jnp.float32)[:, None]          # (L, 1)
    freqs = jnp.exp(
        jnp.arange(0, embed_dim, 2, dtype=jnp.float32)
        * (-math.log(10000.0) / embed_dim)
    )[None, :]                                                                  # (1, E/2)
    arguments = positions * freqs                                               # (L, E/2)
    pe = jnp.zeros((max_length, embed_dim), dtype=jnp.float32)
    pe = pe.at[:, 0::2].set(jnp.sin(arguments))
    pe = pe.at[:, 1::2].set(jnp.cos(arguments))
    return pe                                                                   # (L, E)


# ---------------------------------------------------------------------------
# Pallas kernel: out = dropout(x + pe[seq_tile])
# ---------------------------------------------------------------------------
def _pos_enc_kernel(seed_ref, x_ref, pe_ref, o_ref, *,
                    p: float, training: bool,
                    seq_len: int, embed_dim: int, seq_tile: int):
    # x_ref/o_ref: (TS, E) (batch dim squeezed), pe_ref: (TS, E)
    y = x_ref[...] + pe_ref[...]

    if training and p > 0.0:
        # Inverted dropout.
        # TODO(synk): RNG stream differs from torch.nn.Dropout (cannot match
        # PyTorch's RNG bit-for-bit); keep-probability and 1/(1-p) scaling are
        # equivalent. Counter-based hash keyed on (seed, global element index)
        # => mask is independent of the tiling (no per-tile correlation) and
        # needs no TPU-only pltpu.prng_* primitives.
        s_tile = pl.program_id(0)
        b = pl.program_id(1)
        row = lax.broadcasted_iota(jnp.int32, y.shape, 0) + s_tile * seq_tile
        col = lax.broadcasted_iota(jnp.int32, y.shape, 1)
        gidx = ((b * seq_len + row) * embed_dim + col).astype(jnp.uint32)

        seed_u = seed_ref[0].astype(jnp.uint32)
        h = gidx * jnp.uint32(0x9E3779B1) + seed_u
        h = h ^ (h >> 16)
        h = h * jnp.uint32(0x7FEB352D)
        h = h ^ (h >> 15)
        h = h * jnp.uint32(0x846CA68B)
        h = h ^ (h >> 16)

        thresh = jnp.uint32(int(round(p * (1 << 24))))   # integer threshold
        keep = (h >> 8) >= thresh                        # P(keep) = 1 - p
        scale = jnp.asarray(1.0 / (1.0 - p), dtype=y.dtype)
        y = jnp.where(keep, y * scale, jnp.zeros((), y.dtype))

    o_ref[...] = y.astype(o_ref.dtype)


def _choose_seq_tile(S: int, E: int, itemsize: int,
                     target_bytes: int = 4 * 1024 * 1024) -> int:
    """Largest seq tile (multiple of 8 sublanes) with a ~target_bytes slab.

    2x(x) + 2x(out) + 2x(pe) double buffers of this size stay well inside the
    48 MiB VMEM budget (safe on v7x's 64 MiB physical VMEM) while being large
    enough (>= ~2 MiB per buffer) to approach the HBM roofline.
    """
    if S < 8:
        return S
    ts = (target_bytes // max(1, E * itemsize)) // 8 * 8
    ts = max(8, ts)
    return min(ts, (S // 8) * 8)


def positional_encoder(x: jnp.ndarray,
                       pos_features: jnp.ndarray,
                       *,
                       dropout_p: float = 0.2,
                       training: bool = False,
                       seed: int = 0) -> jnp.ndarray:
    """Forward pass of PositionalEncoder.

    x:            (B, S, E)
    pos_features: (max_length, E) table (made by make_pos_features)
    """
    B, S, E = x.shape
    pe = pos_features.astype(x.dtype)          # bf16-native compute if x is bf16

    TS = _choose_seq_tile(S, E, x.dtype.itemsize)
    if TS % 8 != 0:
        # Tiny-S fallback (S < 8): make the pe block equal its full dims.
        pe = pe[:S]

    seed_arr = jnp.asarray([seed], dtype=jnp.int32)
    kernel = functools.partial(
        _pos_enc_kernel, p=float(dropout_p), training=bool(training),
        seq_len=S, embed_dim=E, seq_tile=TS)

    # B is the innermost grid axis and pe's index_map ignores it, so the pe
    # tile is DMA'd once per S-tile and stays VMEM-resident across B.
    grid = (pl.cdiv(S, TS), B)

    # NOTE: E should be a multiple of 128 for lane-dense (unmasked) stores;
    # typical transformer embed dims satisfy this. Smaller E still works but
    # stores become masked.
    return pl.pallas_call(
        kernel,
        out_shape=jax.ShapeDtypeStruct((B, S, E), x.dtype),
        grid=grid,
        in_specs=[
            pl.BlockSpec(memory_space=pltpu.MemorySpace.SMEM),      # seed scalar
            pl.BlockSpec((None, TS, E), lambda s, b: (b, s, 0)),    # x tile
            pl.BlockSpec((TS, E), lambda s, b: (s, 0)),             # pe tile
        ],
        out_specs=pl.BlockSpec((None, TS, E), lambda s, b: (b, s, 0)),
        compiler_params=pltpu.CompilerParams(
            dimension_semantics=("parallel", "parallel"),
            vmem_limit_bytes=48 * 1024 * 1024,
        ),
    )(seed_arr, x, pe)


# ---------------------------------------------------------------------------
# Demo / correctness check
# ---------------------------------------------------------------------------
if __name__ == "__main__":
    # Small shapes consistent with the module's forward: (batch, seq, embed).
    B, S, E = 2, 8, 128
    MAX_LEN = 16

    key = jax.random.PRNGKey(0)
    x = jax.random.normal(key, (B, S, E), dtype=jnp.float32)

    pos_features = make_pos_features(MAX_LEN, E)

    # Eval-mode forward (dropout is identity in eval, as in PyTorch .eval()).
    out = positional_encoder(x, pos_features, dropout_p=0.2, training=False)
    out = jax.block_until_ready(out)

    ref = x + pos_features[None, :S, :]
    assert out.shape == (B, S, E)
    assert out.dtype == x.dtype
    assert jnp.allclose(out, ref, atol=1e-6, rtol=1e-6)

    # Exercise the in-kernel dropout path (statistical; not compared to torch).
    out_train = positional_encoder(x, pos_features, dropout_p=0.2,
                                   training=True, seed=123)
    out_train = jax.block_until_ready(out_train)
    assert out_train.shape == (B, S, E)
    assert bool(jnp.all(jnp.isfinite(out_train)))

    print("KERNEL_OK")
</pallas_src>

<mosaic_0001>
module attributes {stable_mosaic.version = 11 : i64} {
  func.func @_pos_enc_kernel(%arg0: i32, %arg1: i32, %arg2: memref<1xi32, #tpu.memory_space<smem>>, %arg3: memref<1x8x128xf32, #tpu.memory_space<vmem>>, %arg4: memref<8x128xf32, #tpu.memory_space<vmem>>, %arg5: memref<1x8x128xf32, #tpu.memory_space<vmem>>) attributes {dimension_semantics = [#tpu.dimension_semantics<parallel>, #tpu.dimension_semantics<parallel>], iteration_bounds = array<i64: 1, 2>, scalar_prefetch = 0 : i64, scratch_operands = 0 : i64, tpu.core_type = #tpu.core_type<tc>, window_params = [{transform_indices = @transform_0, window_bounds = array<i64: 1>}, {transform_indices = @transform_1, window_bounds = array<i64: 1, 8, 128>}, {transform_indices = @transform_2, window_bounds = array<i64: 8, 128>}, {transform_indices = @transform_3, window_bounds = array<i64: 1, 8, 128>}]} {
    %c0 = arith.constant 0 : index
    %c0_0 = arith.constant 0 : index
    %c0_1 = arith.constant 0 : index
    %0 = vector.load %arg3[%c0, %c0_0, %c0_1] : memref<1x8x128xf32, #tpu.memory_space<vmem>>, vector<1x8x128xf32>
    %1 = vector.shape_cast %0 : vector<1x8x128xf32> to vector<8x128xf32>
    %c0_2 = arith.constant 0 : index
    %c0_3 = arith.constant 0 : index
    %2 = vector.load %arg4[%c0_2, %c0_3] : memref<8x128xf32, #tpu.memory_space<vmem>>, vector<8x128xf32>
    %3 = arith.addf %1, %2 : vector<8x128xf32>
    %c0_4 = arith.constant 0 : index
    %c0_5 = arith.constant 0 : index
    %c0_6 = arith.constant 0 : index
    %4 = vector.load %arg5[%c0_4, %c0_5, %c0_6] : memref<1x8x128xf32, #tpu.memory_space<vmem>>, vector<1x8x128xf32>
    %5 = vector.shape_cast %4 : vector<1x8x128xf32> to vector<8x128xf32>
    %6 = vector.shape_cast %3 : vector<8x128xf32> to vector<1x8x128xf32>
    tpu.vector_store %arg5[%c0_4, %c0_5, %c0_6], %6 {strides = array<i32>} : memref<1x8x128xf32, #tpu.memory_space<vmem>>, vector<1x8x128xf32>,
    return
  }
  func.func @transform_0(%arg0: i32, %arg1: i32) -> i32 {
    %c0_i32 = arith.constant 0 : i32
    %c0_i32_0 = arith.constant 0 : i32
    return %c0_i32 : i32
  }
  func.func @transform_1(%arg0: i32, %arg1: i32) -> (i32, i32, i32) {
    %c0_i32 = arith.constant 0 : i32
    %c0_i32_0 = arith.constant 0 : i32
    return %arg1, %arg0, %c0_i32 : i32, i32, i32
  }
  func.func @transform_2(%arg0: i32, %arg1: i32) -> (i32, i32) {
    %c0_i32 = arith.constant 0 : i32
    %c0_i32_0 = arith.constant 0 : i32
    return %arg0, %c0_i32 : i32, i32
  }
  func.func @transform_3(%arg0: i32, %arg1: i32) -> (i32, i32, i32) {
    %c0_i32 = arith.constant 0 : i32
    %c0_i32_0 = arith.constant 0 : i32
    return %arg1, %arg0, %c0_i32 : i32, i32, i32
  }
}

</mosaic_0001>

<bundles_post_ra>
// kernel: tpu_custom_call.1
= control target key start
LH: loop header
LB: loop body
LE: loop exit
PB: predicated region body
PF: predicated region fallthrough
CT: control target
= control target key end

     0   :  { %9 = vsyncpa [#allocation4], 0  ;;  %s811_s0 = inlined_call_operand.<no memory space> [shape: s32[1], index: 0, kind: input, shape index: {}]   ;;  %s812_s1 = inlined_call_operand.hbm [shape: f32[2,8,128], index: 1, kind: input, shape index: {}]   ;;  %s813_s2 = inlined_call_operand.hbm [shape: f32[16,128], index: 2, kind: input, shape index: {}]   ;;  %s814_s3 = inlined_call_operand.hbm [shape: f32[2,8,128], index: 3, kind: output, shape index: {}]  }
   0x1   :  { %11 = vsyncpa [#allocation4 + $0x1], 0 }
   0x2   :  { %12 = vsyncpa [#allocation7], 0 }
   0x3   :  { %13 = vsyncpa [#allocation5], 0 }
   0x4   :  { %15 = vsyncpa [#allocation5 + $0x1], 0  ;;  %s592_s12 = smov 0   ;;  %s594_s13 = smov 0  }
   0x5   :  { %s596_s14 = smov 0   ;;  %s598_s0 = smov 0  }
   0x6   :  { %s600_s15 = smov 0   ;;  %s602_s16 = smov 0  }
   0x7 LB: > { %s335_s17 = sadd.s32 4294967295, %s567_s16   ;;  %s336_s18 = sadd.s32 4294967294, %s567_s16   ;;  %s567_s16 = sphi %s602_s16, %s21_s16   ;;  %s563_s15 = sphi %s600_s15, %s839_s15   ;;  %s559_s0 = sphi %s598_s0, %s838_s0   ;;  %s555_s14 = sphi %s596_s14, %s837_s14   ;;  %s551_s13 = sphi %s594_s13, %s836_s13   ;;  %s547_s12 = sphi %s592_s12, %s835_s12  }
   0x8   : > { %p76_p0 = scmp.ne.s32.totalorder %s551_s13, %s547_s12  ;;  %p626_p1 = scmp.eq.s32.totalorder %s335_s17, 0 }
   0x9   : > { %p630_p2 = scmp.eq.s32.totalorder %s335_s17, 1  ;;  %p134_p3 = scmp.eq.s32.totalorder %s336_s18, 1 }
   0xa   : > { %s819_s19 = scalar_select %p626_p1, 1, 0 }
   0xb   : > { %s820_s20 = scalar_select %p630_p2, 1, 0 }
   0xc   : > { %p636_p4 = por %p626_p1, %p76_p0  ;;  %p337_p5 = scmp.ge.s32.totalorder %s567_s16, 1 }
   0xd   : > { %p641_p6 = por %p134_p3, %p76_p0  ;;  %p141_p7 = scmp.lt.s32.totalorder %s567_s16, 3 }
   0xe   : > { %s821_s21 = scalar_select %p636_p4, 1, 0 }
   0xf   : > { %s822_s22 = scalar_select %p641_p6, 1, 0 }
  0x10   : > { %p646_p8 = pnand %p337_p5, %p141_p7  ;;  %s569_s24 = smov [#allocation6]  }
  0x11   : > { %s159_s25 = sshll.u32 %s569_s24, 4  ;;  %s30_s27 = sadd.s32 1, %s563_s15  ;;  %s160_s25 = int_to_ptr.vmem [resolvable:$true] %s159_s25 }
  0x12   : > { %s823_s23 = scalar_select %p646_p8, 1, 0 }
  0x13   : > { %p358_p10 = pneg %p646_p8  ;;  %s63_s28 = sadd.s32 1, %s555_s14 }
  0x14   : > { %p661_p12 = scmp.ge.s32.totalorder %s30_s27, 2  ;;  %s423_s5 = scalar_lea.hbm %s813_s2, 128 }
  0x15   : > { %p655_p11 = pnand %p358_p10, %p626_p1  ;;  %p424_p13 = scmp.ne.s32.totalorder %s813_s2, %s423_s5 }
  0x16   : > { %s825_s29 = scalar_select %p661_p12, 1, 0 }
  0x17   : > { %p425_p0 = pneg %p655_p11  ;;  %s428_s10 = scalar_lea.hbm %s813_s2, 256 }
  0x18   : > { %p429_p7 = scmp.lt.u32.totalorder %s428_s10, %s423_s5  ;;  %p430_p10 = scmp.lt.u32.totalorder %s423_s5, %s813_s2 }
  0x19   : > { %p426_p3 = pnand %p425_p0, %p424_p13 }
  0x1a   : > { %p431_p9 = por %p430_p10, %p429_p7 }
  0x1b   : > { %p427_p5 = pneg %p426_p3 }
  0x1d   : > { %p432_p6 = pnand %p431_p9, %p427_p5 }
  0x1f   : > { %435 = shalt.err (!%p432_p6)
}
  0x20   : > { %s436_s18 = scalar_lea.vmem %s160_s25, 128  ;;  %p444_p2 = scmp.lt.s32.totalorder %s160_s25, %s160_s25 }
  0x21   : > { %p437_p1 = scmp.ne.s32.totalorder %s160_s25, %s436_s18  ;;  %p445_p12 = scmp.lt.s32.totalorder %s436_s18, %s436_s18 }
  0x23   : > { %p439_p4 = pnand %p437_p1, %p425_p0  ;;  %p446_p13 = por %p445_p12, %p444_p2 }
  0x25   : > { %p440_p8 = pneg %p439_p4 }
  0x27   : > { %p447_p3 = pnand %p446_p13, %p440_p8 }
  0x29   : > { %450 = shalt.err (!%p447_p3)
}
  0x2a   : > { %361 = dma.hbm_to_vmem [thread:$0]  (!%p655_p11), %s813_s2, 128, %s160_s25, [#allocation7]  }
  0x2b   : > { %p826_p1 = scmp.ne.s32.totalorder %s825_s29, 0  ;;  %p70_p2 = scmp.ne.s32.totalorder %s555_s14, %s551_s13 }
  0x2c   : > { %p71_p4 = scmp.eq.s32.totalorder %s567_s16, 0  ;;  %p371_p6 = scmp.lt.s32.totalorder %s567_s16, 2 }
  0x2d   : > { %s841_s27 = smov (%p826_p1, %s30_s27), 0  ;;  %p827_p12 = scmp.ne.s32.totalorder %s820_s20, 0 }
  0x2e   : > { %s58_s26 = ssub.s32 %s563_s15, %s841_s27  ;;  %p72_p9 = por %p71_p4, %p70_p2 }
  0x2f   : > { %p61_p8 = scmp.eq.s32.totalorder %s58_s26, 0  ;;  %p696_p0 = por %p827_p12, %p70_p2 }
  0x30   : > { %s170_s5 = sand.u32 1, %s555_s14   ;;  %s341_s29 = sshll.u32 %s563_s15, 7 }
  0x31   : > { %s704_s6 = scalar_select %p61_p8, %s555_s14, %s63_s28  }
  0x32   : > { %s340_s25 = sshll.u32 %s170_s5, 3  ;;  %s710_s9 = scalar_lea.hbm %s812_s1, %s341_s29 }
  0x33   : > { %s174_s20 = scalar_lea.vmem [#allocation3], %s340_s25  ;;  %p714_p11 = pnand %p371_p6, %p72_p9 }
  0x34   : > { %s182_s10 = sshll.u32 %s174_s20, 4  ;;  %s171_s28 = scalar_lea.sflag [#allocation4], %s170_s5  ;;  %s712_s10 = int_to_ptr.vmem [resolvable:$true] %s182_s10 }
  0x35   : > { %s451_s17 = scalar_lea.hbm %s710_s9, 128  ;;  %p453_p7 = pneg %p714_p11 }
  0x36   : > { %p452_p5 = scmp.ne.s32.totalorder %s710_s9, %s451_s17  ;;  %s456_s30 = scalar_lea.hbm %s812_s1, 256 }
  0x37   : > { %p457_p3 = scmp.lt.u32.totalorder %s710_s9, %s812_s1  ;;  %p458_p1 = scmp.lt.u32.totalorder %s456_s30, %s451_s17 }
  0x38   : > { %p454_p10 = pnand %p453_p7, %p452_p5  ;;  %p460_p4 = scmp.lt.u32.totalorder %s451_s17, %s710_s9 }
  0x39   : > { %p459_p2 = por %p458_p1, %p457_p3 }
  0x3a   : > { %p455_p13 = pneg %p454_p10 }
  0x3b   : > { %p461_p6 = por %p460_p4, %p459_p2 }
  0x3d   : > { %p462_p8 = pnand %p461_p6, %p455_p13 }
  0x3f   : > { %465 = shalt.err (!%p462_p8)
}
  0x40   : > { %s466_s5 = scalar_lea.vmem %s712_s10, 128  ;;  %s570_s29 = smov [#allocation3]  }
  0x41   : > { %p467_p9 = scmp.ne.s32.totalorder %s712_s10, %s466_s5  ;;  %s471_s7 = sshll.u32 %s570_s29, 4  ;;  %s472_s7 = int_to_ptr.vmem [resolvable:$false] %s471_s7 }
  0x42   : > { %s473_s8 = scalar_lea.vmem %s472_s7, 256  ;;  %p474_p10 = scmp.lt.s32.totalorder %s712_s10, %s472_s7 }
  0x43   : > { %p469_p12 = pnand %p467_p9, %p453_p7  ;;  %p475_p3 = scmp.lt.s32.totalorder %s473_s8, %s466_s5 }
  0x45   : > { %p470_p5 = pneg %p469_p12  ;;  %p476_p1 = por %p475_p3, %p474_p10 }
  0x47   : > { %p477_p2 = pnand %p476_p1, %p470_p5 }
  0x49   : > { %480 = shalt.err (!%p477_p2)
}
  0x4a   : > { %365 = dma.hbm_to_vmem [thread:$0]  (!%p714_p11), %s710_s9, 128, %s712_s10, %s171_s28  }
  0x4b   : > { %p830_p13 = scmp.ne.s32.totalorder %s823_s23, 0 }
  0x4c   : > { %s746_s20 = sand.u32 (!%p830_p13), 1, %s551_s13   ;;  %p831_p7 = scmp.ne.s32.totalorder (!%p830_p13), %s821_s21, 0 }
  0x4d   : > { %191 = sbr.rel (%p830_p13) target bundleno = 113 (0x71), region = 32  ;;  %s343_s17 = sshll.u32 (!%p830_p13), %s746_s20, 3 }
  0x4e   : > { %s194_s18 = scalar_lea.sflag (!%p830_p13), [#allocation4], %s746_s20  ;;  %s197_s24 = scalar_lea.vmem (!%p830_p13), [#allocation3], %s343_s17 }
  0x54   : > { %534 = dma.done.wait (%p831_p7), %s194_s18, 128  }
  0x55   : > { %536 = vsyncadd (%p831_p7), %s194_s18, 4294967168  ;;  %p832_p4 = scmp.ne.s32.totalorder %s819_s19, 0 }
  0x57   : > { %538 = dma.done.wait (%p832_p4), [#allocation7], 128  }
  0x58   : > { %540 = vsyncadd (%p832_p4), [#allocation7], 4294967168  ;;  %s223_s23 = scalar_lea.vmem [#allocation8], %s343_s17  ;;  %s347_s10 = sshll.u32 %s559_s0, 7  ;;  %v224_v0 = vld [vmem:[%s197_s24] sm:$0xff]  ;;  %v225_v1 = vld [vmem:[#allocation6] sm:$0xff] }
  0x59   : > { %s243_s9 = sshll.u32 %s223_s23, 4  ;;  %v226_v2 = vadd.f32 %v225_v1, %v224_v0  ;;  %s764_s28 = scalar_lea.hbm %s814_s3, %s347_s10  ;;  %s759_s9 = int_to_ptr.vmem [resolvable:$true] %s243_s9 }
  0x5a   : > { %s229_s19 = scalar_lea.sflag [#allocation5], %s746_s20  ;;  %s481_s30 = scalar_lea.vmem %s759_s9, 128 }
  0x5b   : > { %227 = vst [vmem:[%s223_s23] sm:$0xff] %v226_v2  ;;  %p482_p11 = scmp.ne.s32.totalorder %s759_s9, %s481_s30  ;;  %s571_s0 = smov [#allocation8]  }
  0x5c   : > { %s485_s26 = sshll.u32 %s571_s0, 4  ;;  %s486_s26 = int_to_ptr.vmem [resolvable:$false] %s485_s26 }
  0x5d   : > { %p483_p6 = pnand %p482_p11, %p696_p0  ;;  %s487_s25 = scalar_lea.vmem %s486_s26, 256 }
  0x5e   : > { %p488_p9 = scmp.lt.s32.totalorder %s759_s9, %s486_s26  ;;  %p489_p12 = scmp.lt.s32.totalorder %s487_s25, %s481_s30 }
  0x5f   : > { %p484_p8 = pneg %p483_p6 }
  0x60   : > { %p490_p5 = por %p489_p12, %p488_p9 }
  0x62   : > { %p491_p10 = pnand %p490_p5, %p484_p8 }
  0x64   : > { %494 = shalt.err (!%p491_p10)
}
  0x65   : > { %s495_s5 = scalar_lea.hbm %s764_s28, 128  ;;  %s499_s8 = scalar_lea.hbm %s814_s3, 256 }
  0x66   : > { %p496_p3 = scmp.ne.s32.totalorder %s764_s28, %s495_s5  ;;  %p500_p13 = scmp.lt.u32.totalorder %s764_s28, %s814_s3 }
  0x67   : > { %p501_p7 = scmp.lt.u32.totalorder %s499_s8, %s495_s5  ;;  %p503_p11 = scmp.lt.u32.totalorder %s495_s5, %s764_s28 }
  0x68   : > { %p497_p1 = pnand %p496_p3, %p696_p0 }
  0x69   : > { %p502_p4 = por %p501_p7, %p500_p13 }
  0x6a   : > { %p498_p2 = pneg %p497_p1 }
  0x6b   : > { %p504_p6 = por %p503_p11, %p502_p4 }
  0x6d   : > { %p505_p8 = pnand %p504_p6, %p498_p2 }
  0x6f   : > { %508 = shalt.err (!%p505_p8)
}
  0x70   : > { %356 = dma.vmem_to_hbm [thread:$0]  (%p696_p0), %s759_s9, 128, %s764_s28, %s229_s19  }
  0x71 PF: > { %s255_s18 = sand.u32 1, %s547_s12   ;;  %p833_p9 = scmp.ne.s32.totalorder %s822_s22, 0 }
  0x72   : > { %p834_p12 = scmp.ge.s32.totalorder %s567_s16, 2  ;;  %s256_s24 = scalar_lea.sflag [#allocation5], %s255_s18 }
  0x74   : > { %p367_p5 = pnand %p834_p12, %p833_p9 }
  0x76   : > { %542 = dma.done.wait (!%p367_p5), %s256_s24, 128  }
  0x77   : > { %544 = vsyncadd (!%p367_p5), %s256_s24, 4294967168  ;;  %s21_s16 = sadd.s32 1, %s567_s16   ;;  %s835_s12 = smov %s551_s13 }
  0x78   : > { %p18_p10 = scmp.ge.s32.totalorder %s21_s16, 4   ;;  %s836_s13 = smov %s555_s14 }
  0x79   : > { %s837_s14 = smov %s704_s6  ;;  %s838_s0 = smov %s563_s15 }
  0x7a   : > { %s839_s15 = smov %s841_s27  ;;  %20 = sbr.rel (!%p18_p10) target bundleno = 7 (0x7), region = 82 }
  0x81   :  { %261 = vsyncpa [#allocation4], 1 }
  0x82   :  { %263 = vsyncpa [#allocation4 + $0x1], 1 }
  0x83   :  { %264 = vsyncpa [#allocation7], 1 }
  0x84   :  { %265 = vsyncpa [#allocation5], 1 }
  0x85   :  { %267 = vsyncpa [#allocation5 + $0x1], 1 }

</bundles_post_ra>
